<compile_context>
chip_gen: v5e
topology: v5e:2x2
jax: 0.10.0
libtpu: 0.0.40
codegen_flags: <defaults>
</compile_context>

<pallas_src>
import jax
import jax.numpy as jnp
from jax.experimental import pallas as pl
from jax.experimental.pallas import tpu as pltpu

_MiB = 1024 * 1024


def _vmem_capacity_bytes():
    """Generation-aware VMEM capacity; falls back to the smallest (v7x, 64 MiB)."""
    try:
        info = pltpu.get_tpu_info()
        return int(getattr(info, "vmem_capacity_bytes", 64 * _MiB))
    except Exception:
        return 64 * _MiB


def _sublane_align(itemsize):
    # f32 -> 8, bf16 -> 16, int8/fp8 -> 32 (sub-32-bit dtypes pack along sublanes).
    return max(8, 32 // max(1, int(itemsize)))


def _floor_pow2(n):
    n = max(int(n), 1)
    return 1 << (n.bit_length() - 1)


def _ceil_pow2(n):
    n = max(int(n), 1)
    return 1 << (n - 1).bit_length()


def _pick_tile_t(t_out, f, itemsize, requested=None):
    """Time-tile size: a power of two (so the halo block divides it evenly),
    dtype-aware sublane aligned, sized so ~5 resident (tile_t, F) blocks
    (2 in + 2 out double-buffers + halo/slack) fit a generation-aware VMEM
    budget.  Big blocks amortize the ~0.35us per-grid-step overhead."""
    align = _sublane_align(itemsize)
    if requested is None:
        budget = min(_vmem_capacity_bytes() * 3 // 8, 48 * _MiB)
        row_bytes = max(1, f * itemsize)
        tile = budget // (5 * row_bytes)
    else:
        tile = int(requested)
    tile = _floor_pow2(tile)
    tile = min(tile, _ceil_pow2(t_out))   # never bigger than the whole output
    tile = max(tile, align)
    return int(tile)


def _make_kernel(tile_t, halo, s, left, t_in, value):
    """Build the per-tile kernel.  All closed-over values are Python scalars
    (they lower to literals), so nothing is captured as a jaxpr constant."""

    def _finish(i, tile, o_ref):
        # Pad mask: output rows outside [left, left + t_in) are pad rows.
        # One (tile_t, 1) iota column + one unsigned compare, broadcast over
        # lanes inside jnp.where; the pad value stays a Python scalar.
        row = jax.lax.broadcasted_iota(jnp.int32, (tile_t, 1), 0)
        out_row = i * tile_t + row
        in_copy = (out_row - left).astype(jnp.uint32) < jnp.uint32(t_in)
        o_ref[...] = jnp.where(in_copy, tile, value).astype(o_ref.dtype)

    if s == 0:
        # Input and output tiles are block-aligned: pure copy + pad mask.
        def kernel(x_ref, o_ref):
            _finish(pl.program_id(0), x_ref[...], o_ref)
    else:
        def kernel(halo_ref, x_ref, o_ref):
            # Rows [0, s) of this output tile come from the tail of the
            # previous input block (fetched as a tiny halo block); rows
            # [s, tile_t) come from the head of the current block.  Static
            # slices + one concatenate -- no carry, no roll, no scratch.
            head = halo_ref[halo - s:, :]            # (s, F)
            body = x_ref[: tile_t - s, :]            # (tile_t - s, F)
            _finish(pl.program_id(0), jnp.concatenate([head, body], axis=0), o_ref)

    return kernel


def random_pad(x, left, right, *, value=0.0, tile_t=None):
    """Pad the time (first) axis of a 2-D (time, freq) array with `left` rows
    of `value` in front and `right` rows behind.  left/right are Python ints
    (the output shape depends on them, exactly as in torch)."""
    if x.ndim != 2:
        raise ValueError("random_pad expects a 2-D (time, freq) array")
    left, right = int(left), int(right)
    t_in, f = x.shape
    t_out = t_in + left + right

    tile_t = _pick_tile_t(t_out, f, x.dtype.itemsize, tile_t)
    q, s = divmod(left, tile_t)          # whole-block offset / intra-block shift
    nb_in = pl.cdiv(t_in, tile_t)
    nb_out = pl.cdiv(t_out, tile_t)

    def cur_map(i):
        # Output tile i reads input block (i - q); clamp so pure-pad head/tail
        # tiles fetch a valid (repeated -> DMA-skipped, never-selected) block.
        return (jnp.maximum(jnp.minimum(i - q, nb_in - 1), 0), 0)

    in_specs = [pl.BlockSpec((tile_t, f), cur_map)]
    operands = (x,)

    if s > 0:
        # Small halo block carrying the tail of the previous input block.
        halo = min(max(_sublane_align(x.dtype.itemsize), _ceil_pow2(s)), tile_t)
        ratio = tile_t // halo
        nbh_in = pl.cdiv(t_in, halo)

        def halo_map(i):
            return (jnp.maximum(jnp.minimum((i - q) * ratio - 1, nbh_in - 1), 0), 0)

        in_specs = [pl.BlockSpec((halo, f), halo_map)] + in_specs
        operands = (x, x)
    else:
        halo = 0

    kernel = _make_kernel(tile_t, halo, s, left, t_in, float(value))

    vmem_limit = 64 * _MiB if _vmem_capacity_bytes() >= 128 * _MiB else 32 * _MiB

    return pl.pallas_call(
        kernel,
        out_shape=jax.ShapeDtypeStruct((t_out, f), x.dtype),
        grid=(nb_out,),
        in_specs=in_specs,
        out_specs=pl.BlockSpec((tile_t, f), lambda i: (i, 0)),
        compiler_params=pltpu.CompilerParams(
            dimension_semantics=("parallel",),     # no carry -> megacore-shardable
            vmem_limit_bytes=vmem_limit,
        ),
    )(*operands)


class RandomPad:
    """JAX/Pallas port of the PyTorch RandomPad module."""

    def __init__(self, value=0.0, padding=0):
        self.value = value
        self.padding = padding
        self.training = True

    def __call__(self, x, key=None, tile_t=None):
        if not (self.training and self.padding > 0):
            return x
        # torch draws left/right on host (torch.empty(2).random_(padding)); JAX
        # needs them host-side too because the output shape depends on them.
        if key is None:
            key = jax.random.PRNGKey(0)
        lr = jax.random.randint(key, (2,), 0, self.padding)
        left, right = int(lr[0]), int(lr[1])
        return random_pad(x, left, right, value=self.value, tile_t=tile_t)


if __name__ == "__main__":
    key = jax.random.PRNGKey(0)
    kx, kpad = jax.random.split(key)

    # Small (time, freq) spectrogram; freq = 128 keeps output stores lane-dense.
    T, F = 50, 128
    padding, value = 8, 0.25
    x = jax.random.normal(kx, (T, F), dtype=jnp.float32)

    # Draw left/right once (host ints, as in torch) so the reference matches.
    lr = jax.random.randint(kpad, (2,), 0, padding)
    left, right = int(lr[0]), int(lr[1])

    # Small tile so the grid has several steps (exercises the halo fetch, the
    # intra-tile shift and ragged first/last blocks).
    y = random_pad(x, left, right, value=value, tile_t=16)
    jax.block_until_ready(y)
    ref = jnp.pad(x, ((left, right), (0, 0)), constant_values=value)
    assert y.shape == ref.shape, (y.shape, ref.shape)
    assert jnp.array_equal(y, ref), "RandomPad kernel mismatch vs reference"

    # Exercise q > 0 (left spans more than one tile), exact-block left, and
    # the s == 0 / left == 0 path.
    for l2, r2 in ((19, 5), (16, 3), (0, 7)):
        y2 = random_pad(x, l2, r2, value=value, tile_t=16)
        jax.block_until_ready(y2)
        ref2 = jnp.pad(x, ((l2, r2), (0, 0)), constant_values=value)
        assert jnp.array_equal(y2, ref2), ("mismatch", l2, r2)

    # Module wrapper with auto-sized (large, single) tile.
    module = RandomPad(value=value, padding=padding)
    y3 = module(x, key=kpad)
    jax.block_until_ready(y3)
    assert jnp.array_equal(y3, ref), "RandomPad module-path mismatch vs reference"

    # Eval mode: identity.
    module.training = False
    y_eval = module(x)
    jax.block_until_ready(y_eval)
    assert jnp.array_equal(y_eval, x)

    print("KERNEL_OK")
</pallas_src>

<mosaic_0001>
module attributes {stable_mosaic.version = 11 : i64} {
  func.func @kernel(%arg0: i32, %arg1: memref<8x128xf32, #tpu.memory_space<vmem>>, %arg2: memref<16x128xf32, #tpu.memory_space<vmem>>, %arg3: memref<16x128xf32, #tpu.memory_space<vmem>>) attributes {dimension_semantics = [#tpu.dimension_semantics<parallel>], iteration_bounds = array<i64: 4>, scalar_prefetch = 0 : i64, scratch_operands = 0 : i64, tpu.core_type = #tpu.core_type<tc>, window_params = [{transform_indices = @transform_0, window_bounds = array<i64: 8, 128>}, {transform_indices = @transform_1, window_bounds = array<i64: 16, 128>}, {transform_indices = @transform_2, window_bounds = array<i64: 16, 128>}]} {
    %c2 = arith.constant 2 : index
    %c0 = arith.constant 0 : index
    %0 = vector.load %arg1[%c2, %c0] : memref<8x128xf32, #tpu.memory_space<vmem>>, vector<6x128xf32>
    %c0_0 = arith.constant 0 : index
    %c0_1 = arith.constant 0 : index
    %1 = vector.load %arg2[%c0_0, %c0_1] : memref<16x128xf32, #tpu.memory_space<vmem>>, vector<10x128xf32>
    %2 = tpu.concatenate %0, %1 in 0 : vector<6x128xf32>, vector<10x128xf32> -> vector<16x128xf32>
    %3 = tpu.iota {dimensions = array<i32: 0>} : vector<16x1xi32>
    %c16_i32 = arith.constant 16 : i32
    %4 = arith.muli %arg0, %c16_i32 : i32
    %5 = vector.broadcast %4 : i32 to vector<16x1xi32>
    %6 = arith.addi %5, %3 : vector<16x1xi32>
    %c6_i32 = arith.constant 6 : i32
    %7 = vector.broadcast %c6_i32 : i32 to vector<16x1xi32>
    %8 = arith.subi %6, %7 : vector<16x1xi32>
    %c50_i32 = arith.constant 50 : i32
    %9 = vector.broadcast %c50_i32 : i32 to vector<16x1xi32>
    %10 = arith.cmpi ult, %8, %9 : vector<16x1xi32>
    %cst = arith.constant 2.500000e-01 : f32
    %11 = vector.shape_cast %10 : vector<16x1xi1> to vector<16x1xi1>
    %12 = vector.broadcast %11 : vector<16x1xi1> to vector<16x128xi1>
    %13 = vector.broadcast %cst : f32 to vector<16x128xf32>
    %14 = arith.select %12, %2, %13 : vector<16x128xi1>, vector<16x128xf32>
    %c0_2 = arith.constant 0 : index
    %c0_3 = arith.constant 0 : index
    %15 = vector.load %arg3[%c0_2, %c0_3] : memref<16x128xf32, #tpu.memory_space<vmem>>, vector<16x128xf32>
    tpu.vector_store %arg3[%c0_2, %c0_3], %14 {strides = array<i32>} : memref<16x128xf32, #tpu.memory_space<vmem>>, vector<16x128xf32>,
    return
  }
  func.func @transform_0(%arg0: i32) -> (i32, i32) {
    %c0_i32 = arith.constant 0 : i32
    %0 = arith.subi %arg0, %c0_i32 : i32
    %c2_i32 = arith.constant 2 : i32
    %1 = arith.muli %0, %c2_i32 : i32
    %c1_i32 = arith.constant 1 : i32
    %2 = arith.subi %1, %c1_i32 : i32
    %c6_i32 = arith.constant 6 : i32
    %3 = arith.minsi %2, %c6_i32 : i32
    %c0_i32_0 = arith.constant 0 : i32
    %4 = arith.maxsi %3, %c0_i32_0 : i32
    %c0_i32_1 = arith.constant 0 : i32
    %c0_i32_2 = arith.constant 0 : i32
    return %4, %c0_i32_1 : i32, i32
  }
  func.func @transform_1(%arg0: i32) -> (i32, i32) {
    %c0_i32 = arith.constant 0 : i32
    %0 = arith.subi %arg0, %c0_i32 : i32
    %c3_i32 = arith.constant 3 : i32
    %1 = arith.minsi %0, %c3_i32 : i32
    %c0_i32_0 = arith.constant 0 : i32
    %2 = arith.maxsi %1, %c0_i32_0 : i32
    %c0_i32_1 = arith.constant 0 : i32
    %c0_i32_2 = arith.constant 0 : i32
    return %2, %c0_i32_1 : i32, i32
  }
  func.func @transform_2(%arg0: i32) -> (i32, i32) {
    %c0_i32 = arith.constant 0 : i32
    %c0_i32_0 = arith.constant 0 : i32
    return %arg0, %c0_i32 : i32, i32
  }
}

</mosaic_0001>

<bundles_post_ra>
// kernel: tpu_custom_call.1
= control target key start
LH: loop header
LB: loop body
LE: loop exit
PB: predicated region body
PF: predicated region fallthrough
CT: control target
= control target key end

     0   :  { %7 = vsyncpa [#allocation3], 0  ;;  %s1041_s0 = inlined_call_operand.hbm [shape: f32[50,128], index: 0, kind: input, shape index: {}]   ;;  %s1042_s1 = inlined_call_operand.hbm [shape: f32[50,128], index: 1, kind: input, shape index: {}]   ;;  %s1043_s2 = inlined_call_operand.hbm [shape: f32[62,128], index: 2, kind: output, shape index: {}]  }
   0x1   :  { %9 = vsyncpa [#allocation3 + $0x1], 0 }
   0x2   :  { %10 = vsyncpa [#allocation6], 0 }
   0x3   :  { %12 = vsyncpa [#allocation6 + $0x1], 0 }
   0x4   :  { %13 = vsyncpa [#allocation4], 0 }
   0x5   :  { %15 = vsyncpa [#allocation4 + $0x1], 0  ;;  %s782_s9 = smov 0   ;;  %s784_s10 = smov 0  }
   0x6   :  { %s786_s11 = smov 0   ;;  %s788_s12 = smov 0  }
   0x7   :  { %s790_s13 = smov 0   ;;  %s792_s14 = smov 0  }
   0x8   :  { %s794_s15 = smov 0   ;;  %s796_s16 = smov 0  }
   0x9   :  { %s798_s17 = smov 0   ;;  %s800_s18 = smov 0  }
   0xa LB: > { %1050 = sst [smem:[#allocation11_spill]] %s724_s9  ;;  %s831_s19 = sadd.s32 4294967295, %s760_s18   ;;  %s760_s18 = sphi %s800_s18, %s1068_s18   ;;  %s756_s17 = sphi %s798_s17, %s1073_s17   ;;  %s752_s16 = sphi %s796_s16, %s1080_s16   ;;  %s748_s15 = sphi %s794_s15, %s1079_s15   ;;  %s744_s14 = sphi %s792_s14, %s1078_s14   ;;  %s740_s13 = sphi %s790_s13, %s1077_s13   ;;  %s736_s12 = sphi %s788_s12, %s1076_s12   ;;  %s732_s11 = sphi %s786_s11, %s1070_s11   ;;  %s728_s10 = sphi %s784_s10, %s1075_s10   ;;  %s724_s9 = sphi %s782_s9, %s1074_s9  }
   0xb   : > { %1051 = sst [smem:[#allocation12_spill]] %s732_s11  ;;  %s403_s20 = sadd.s32 4294967294, %s760_s18  }
   0xc   : > { %1052 = sst [smem:[#allocation13_spill]] %s756_s17  ;;  %s835_s21 = sadd.s32 1, %s760_s18  }
   0xd   : > { %1053 = sst [smem:[#allocation14_spill]] %s835_s21  ;;  %s404_s22 = sshll.u32 %s760_s18, 1 }
   0xe   : > { %s405_s23 = sadd.s32 4294967295, %s404_s22  ;;  %s468_s24 = sadd.s32 2, %s404_s22 }
   0xf   : > { %p27_p0 = scmp.lt.s32.totalorder %s405_s23, 6  ;;  %p406_p1 = scmp.gt.s32.totalorder %s405_s23, 0 }
  0x10   : > { %s412_s25 = sadd.s32 4294967295, %s468_s24  ;;  %s40_s26 = sadd.s32 1, %s756_s17 }
  0x11   : > { %s1082_s23 = smov (!%p27_p0, %s405_s23), 6  ;;  %p33_p2 = scmp.lt.s32.totalorder %s412_s25, 6 }
  0x12   : > { %p413_p3 = scmp.gt.s32.totalorder %s412_s25, 0  ;;  %s1084_s23 = smov (!%p406_p1, %s1082_s23), 0 }
  0x13   : > { %s1086_s25 = smov (!%p33_p2, %s412_s25), 6  ;;  %p47_p4 = scmp.ne.s32.totalorder %s756_s17, %s752_s16 }
  0x14   : > { %p48_p5 = scmp.eq.s32.totalorder %s760_s18, 0  ;;  %s1088_s25 = smov (!%p413_p3, %s1086_s25), 0 }
  0x15   : > { %p53_p7 = scmp.ne.s32.totalorder %s752_s16, %s748_s15  ;;  %s37_s28 = ssub.s32 %s1084_s23, %s1088_s25 }
  0x16   : > { %p846_p6 = por %p48_p5, %p47_p4  ;;  %p54_p8 = scmp.eq.s32.totalorder %s831_s19, 0 }
  0x17   : > { %p38_p9 = scmp.eq.s32.totalorder %s37_s28, 0  ;;  %p63_p10 = scmp.lt.s32.totalorder %s760_s18, 3 }
  0x18   : > { %p856_p11 = por %p54_p8, %p53_p7  ;;  %p418_p12 = scmp.gt.s32.totalorder %s760_s18, 0 }
  0x19   : > { %s862_s30 = scalar_select %p38_p9, %s756_s17, %s40_s26  }
  0x1a   : > { %s64_s3 = scalar_select %p63_p10, %s760_s18, 3 }
  0x1b   : > { %1056 = sst [smem:[#allocation15_spill]] %s862_s30  ;;  %p67_p13 = scmp.lt.s32.totalorder %s835_s21, 3 }
  0x1c   : > { %p423_p0 = scmp.gt.s32.totalorder %s835_s21, 0  ;;  %s1090_s3 = smov (!%p418_p12, %s64_s3), 0 }
  0x1d   : > { %s68_s4 = scalar_select %p67_p13, %s835_s21, 3 }
  0x1e   : > { %s74_s5 = sadd.s32 1, %s744_s14  ;;  %p81_p1 = scmp.ne.s32.totalorder %s744_s14, %s740_s13 }
  0x1f   : > { %s1092_s4 = smov (!%p423_p0, %s68_s4), 0  ;;  %p87_p3 = scmp.ne.s32.totalorder %s740_s13, %s736_s12 }
  0x20   : > { %p875_p2 = por %p81_p1, %p48_p5  ;;  %s71_s7 = ssub.s32 %s1090_s3, %s1092_s4 }
  0x21   : > { %s97_s8 = ssub.s32 %s760_s18, %s835_s21  ;;  %p72_p4 = scmp.eq.s32.totalorder %s71_s7, 0 }
  0x22   : > { %p886_p7 = por %p87_p3, %p54_p8  ;;  %p98_p9 = scmp.eq.s32.totalorder %s97_s8, 0 }
  0x23   : > { %s100_s22 = sadd.s32 1, %s732_s11  ;;  %p110_p10 = scmp.ne.s32.totalorder %s732_s11, %s728_s10 }
  0x24   : > { %s892_s24 = scalar_select %p72_p4, %s744_s14, %s74_s5  }
  0x25   : > { %s895_s25 = scalar_select %p98_p9, %s732_s11, %s100_s22  }
  0x26   : > { %1059 = sst [smem:[#allocation16_spill]] %s892_s24  ;;  %p111_p5 = scmp.eq.s32.totalorder %s831_s19, 3 }
  0x27   : > { %1060 = sst [smem:[#allocation17_spill]] %s895_s25  ;;  %p116_p12 = scmp.ne.s32.totalorder %s728_s10, %s724_s9 }
  0x28   : > { %p117_p13 = scmp.eq.s32.totalorder %s403_s20, 3  ;;  %p904_p0 = por %p111_p5, %p110_p10 }
  0x29   : > { %p429_p8 = scmp.ge.s32.totalorder %s760_s18, 4 }
  0x2a   : > { %p908_p1 = por %p117_p13, %p116_p12  ;;  %s137_s28 = sand.u32 (!%p429_p8), 1, %s756_s17  }
  0x2b   : > { %133 = sbr.rel (%p429_p8) target bundleno = 96 (0x60), region = 16  ;;  %s438_s4 = sshll.u32 (!%p429_p8), %s1084_s23, 3 }
  0x2c   : > { %s1062_s26 = scalar_select %p908_p1, 1, 0 }
  0x2d   : > { %s430_s5 = sshll.u32 (!%p429_p8), %s137_s28, 3  ;;  %s151_s20 = scalar_lea.hbm (!%p429_p8), %s1041_s0, %s438_s4 }
  0x2e   : > { %1063 = sst [smem:[#allocation18_spill]] %s1062_s26  ;;  %s153_s22 = sshll.u32 (!%p429_p8), %s151_s20, 4  ;;  %s154_s22 = int_to_ptr.hbm [resolvable:$true] %s153_s22 }
  0x2f   : > { %s141_s30 = scalar_lea.vmem (!%p429_p8), [#allocation2], %s430_s5  ;;  %s138_s25 = scalar_lea.sflag (!%p429_p8), [#allocation3], %s137_s28 }
  0x30   : > { %s155_s24 = sshll.u32 %s141_s30, 4  ;;  %s575_s11 = sshra.s32 %s154_s22, 4  ;;  %s156_s24 = int_to_ptr.vmem [resolvable:$true] %s155_s24  ;;  %s576_s11 = int_to_ptr.hbm [resolvable:$true] %s575_s11 }
  0x31   : > { %s577_s21 = scalar_lea.hbm %s576_s11, 8  ;;  %s581_s26 = scalar_lea.hbm %s1041_s0, 56 }
  0x32   : > { %p578_p3 = scmp.ne.s32.totalorder %s576_s11, %s577_s21  ;;  %p582_p10 = scmp.lt.s32.totalorder %s576_s11, %s1041_s0 }
  0x33   : > { %p583_p5 = scmp.lt.s32.totalorder %s581_s26, %s577_s21 }
  0x34   : > { %p579_p4 = pnand %p578_p3, %p846_p6 }
  0x35   : > { %p584_p12 = por %p583_p5, %p582_p10 }
  0x36   : > { %p580_p9 = pneg %p579_p4 }
  0x38   : > { %p585_p13 = pnand %p584_p12, %p580_p9 }
  0x3a   : > { %588 = shalt.err (!%p585_p13)
}
  0x3b   : > { %481 = dma.hbm_to_vmem [thread:$0]  (%p846_p6), %s154_s22, 128, %s156_s24, %s138_s25  }
  0x3c   : > { %161 = sbr.rel (!%p875_p2) target bundleno = 96 (0x60), region = 24  ;;  %s162_s30 = sand.u32 (%p875_p2), 1, %s744_s14  }
  0x3d   : > { %s445_s28 = sshll.u32 (%p875_p2), %s1090_s3, 1  ;;  %s439_s17 = sshll.u32 (%p875_p2), %s162_s30, 4 }
  0x3e   : > { %s172_s4 = ssub.s32 (%p875_p2), 7, %s445_s28  ;;  %s935_s26 = scalar_lea.sflag (%p875_p2), [#allocation6], %s162_s30 }
  0x3f   : > { %p173_p8 = scmp.lt.s32.totalorder (%p875_p2), %s172_s4, 2  ;;  %s166_s27 = scalar_lea.vmem (%p875_p2), [#allocation5], %s439_s17 }
  0x41   : > { %s1094_s4 = smov (!%p173_p8, %s172_s4), 2 }
  0x42   : > { %s446_s9 = sshll.u32 %s1094_s4, 3 }
  0x43   : > { %s176_s11 = ssub.s32 16, %s446_s9 }
  0x44   : > { %s177_s21 = sshll.u32 %s176_s11, 4 }
  0x45   : > { %178 = vsyncadd %s935_s26, %s177_s21  ;;  %p938_p6 = scmp.ne.s32.totalorder %s446_s9, 0  ;;  %s479_s24 = sshll.u32 %s1090_s3, 4 }
  0x46   : > { %s181_s8 = scalar_lea.hbm %s1042_s1, %s479_s24  ;;  %s946_s20 = sshll.u32 %s166_s27, 4  ;;  %s186_s20 = int_to_ptr.vmem [resolvable:$true] %s946_s20 }
  0x47   : > { %s183_s22 = sshll.u32 %s181_s8, 4  ;;  %s450_s23 = sshll.u32 %s1094_s4, 7  ;;  %s949_s22 = int_to_ptr.hbm [resolvable:$true] %s183_s22 }
  0x48   : > { %s603_s7 = sshra.s32 %s949_s22, 4  ;;  %s605_s30 = sshrl.u32 %s450_s23, 4  ;;  %s604_s7 = int_to_ptr.hbm [resolvable:$true] %s603_s7 }
  0x49   : > { %s610_s28 = scalar_lea.hbm %s604_s7, %s605_s30  ;;  %s614_s9 = scalar_lea.hbm %s1042_s1, 56 }
  0x4a   : > { %p611_p2 = scmp.ne.s32.totalorder %s604_s7, %s610_s28  ;;  %p615_p9 = scmp.lt.s32.totalorder %s604_s7, %s1042_s1 }
  0x4b   : > { %p616_p10 = scmp.lt.s32.totalorder %s614_s9, %s610_s28 }
  0x4c   : > { %p612_p3 = pnand %p611_p2, %p938_p6 }
  0x4d   : > { %p617_p5 = por %p616_p10, %p615_p9 }
  0x4e   : > { %p613_p4 = pneg %p612_p3 }
  0x50   : > { %p618_p12 = pnand %p617_p5, %p613_p4 }
  0x52   : > { %621 = shalt.err (!%p618_p12)
}
  0x53   : > { %s622_s27 = sshra.s32 %s186_s20, 4  ;;  %s762_s25 = smov [#allocation5]   ;;  %s623_s27 = int_to_ptr.vmem [resolvable:$true] %s622_s27 }
  0x54   : > { %s629_s24 = scalar_lea.vmem %s623_s27, %s605_s30  ;;  %s633_s5 = scalar_lea.vmem %s762_s25, 32 }
  0x55   : > { %p630_p13 = scmp.ne.s32.totalorder %s623_s27, %s629_s24  ;;  %p635_p3 = scmp.lt.s32.totalorder %s633_s5, %s629_s24 }
  0x57   : > { %p631_p8 = pnand %p630_p13, %p938_p6 }
  0x59   : > { %p632_p2 = pneg %p631_p8 }
  0x5b   : > { %p637_p1 = pnand %p635_p3, %p632_p2 }
  0x5d   : > { %640 = shalt.err (!%p637_p1)
}
  0x5e   : > { %s763_s8 = smov 128   ;;  %s764_s7 = smov 8  }
  0x5f   : > { %191 = dma.hbm_to_vmem [thread:$0]  (%p938_p6), %s949_s22, %s450_s23, %s186_s20, %s935_s26, %s763_s8, %s763_s8, %s764_s7  }
  0x60 PF: > { %p451_p4 = scmp.ge.s32.totalorder %s760_s18, 1  ;;  %p193_p9 = scmp.lt.s32.totalorder %s760_s18, 5 }
  0x62   : > { %p194_p10 = pnand %p451_p4, %p193_p9 }
  0x63   : > { %s199_s30 = sand.u32 (!%p194_p10), 1, %s752_s16  }
  0x64   : > { %197 = sbr.rel (%p194_p10) target bundleno = 128 (0x80), region = 28  ;;  %s452_s28 = sshll.u32 (!%p194_p10), %s199_s30, 3 }
  0x65   : > { %s200_s3 = scalar_lea.sflag (!%p194_p10), [#allocation3], %s199_s30  ;;  %s203_s17 = scalar_lea.vmem (!%p194_p10), [#allocation2], %s452_s28 }
  0x69   : > { %711 = dma.done.wait (%p856_p11), %s200_s3, 128  }
  0x6a   : > { %713 = vsyncadd (%p856_p11), %s200_s3, 4294967168  ;;  %s209_s4 = sand.u32 1, %s740_s13  }
  0x6b   : > { %s453_s26 = sshll.u32 %s209_s4, 4  ;;  %s210_s6 = scalar_lea.sflag [#allocation6], %s209_s4 }
  0x6c   : > { %s213_s20 = scalar_lea.vmem [#allocation5], %s453_s26 }
  0x6d   : > { %715 = dma.done.wait (%p886_p7), %s210_s6, 256  }
  0x6e   : > { %717 = vsyncadd (%p886_p7), %s210_s6, 4294967040  ;;  %s237_s22 = sand.u32 1, %s728_s10   ;;  %v268_v0 = vlaneseq  ;;  %s455_s23 = sshll.u32 %s831_s19, 4  ;;  %v256_v7 = vld [vmem:[%s203_s17 + $0x2] sm:$0x3f]  ;;  %v257_v8 = vld [vmem:[%s213_s20] sm:$0xff] }
  0x6f   : > { %v272_v1 = vstv %s455_s23  ;;  %s454_s29 = sshll.u32 %s237_s22, 4  ;;  %s303_s21 = scalar_lea.hbm %s1043_s2, %s455_s23  ;;  %vm261_vm0 = vcmask 1045504   ;;  %v258_v9 = vld [vmem:[%s213_s20 + $0x8] sm:$0x3]  ;;  %v262_v10 = vrot.slane %v257_v8, 2 }
  0x70   : > { %v269_v2 = vshrl.u32 %v268_v0, 7  ;;  %s239_s15 = scalar_lea.vmem [#allocation7], %s454_s29  ;;  %s306_s27 = sshll.u32 %s303_s21, 4  ;;  %v263_v12 = vrot.slane %v258_v9, 2  ;;  %s307_s27 = int_to_ptr.hbm [resolvable:$true] %s306_s27 }
  0x71   : > { %s304_s19 = sshll.u32 %s239_s15, 4  ;;  %v267_v14 = vsel %vm261_vm0, %v256_v7, %v262_v10  ;;  %s292_s24 = scalar_lea.sflag [#allocation4], %s237_s22  ;;  %s305_s19 = int_to_ptr.vmem [resolvable:$true] %s304_s19 }
  0x72   : > { %v273_v3 = vadd.s32 %v272_v1, %v269_v2  ;;  %v270_v4 = vadd.s32 8, %v269_v2  ;;  %v264_v15 = vsel %vm261_vm0, %v262_v10, %v263_v12  ;;  %s656_s25 = sshra.s32 %s307_s27, 4  ;;  %s662_s30 = scalar_lea.hbm %s1043_s2, 64  ;;  %s657_s25 = int_to_ptr.hbm [resolvable:$true] %s656_s25 }
  0x73   : > { %s658_s5 = scalar_lea.hbm %s657_s25, 16  ;;  %p663_p6 = scmp.lt.s32.totalorder %s657_s25, %s1043_s2 }
  0x74   : > { %v456_v5 = vadd.s32 4294967290, %v273_v3  ;;  %v274_v6 = vadd.s32 %v272_v1, %v270_v4  ;;  %p659_p11 = scmp.ne.s32.totalorder %s657_s25, %s658_s5  ;;  %p664_p5 = scmp.lt.s32.totalorder %s662_s30, %s658_s5 }
  0x76   : > { %v458_v11 = vxor.u32 2147483648, %v456_v5  ;;  %v457_v13 = vadd.s32 4294967290, %v274_v6  ;;  %p660_p7 = pnand %p659_p11, %p904_p0  ;;  %p665_p12 = por %p664_p5, %p663_p6 }
  0x78   : > { %vm279_vm1 = vcmp.lt.s32.totalorder %v458_v11, 2147483698  ;;  %v459_v16 = vxor.u32 2147483648, %v457_v13  ;;  %p661_p1 = pneg %p660_p7 }
  0x79   : > { %v287_v17 = vsel %vm279_vm1, %v267_v14, 0.25 }
  0x7a   : > { %289 = vst [vmem:[%s239_s15] sm:$0xff] %v287_v17  ;;  %vm282_vm2 = vcmp.lt.s32.totalorder %v459_v16, 2147483698  ;;  %p666_p13 = pnand %p665_p12, %p661_p1 }
  0x7b   : > { %v288_v18 = vsel %vm282_vm2, %v264_v15, 0.25 }
  0x7c   : > { %290 = vst [vmem:[%s239_s15 + $0x8] sm:$0xff] %v288_v18 }
  0x7d   : > { %669 = shalt.err (!%p666_p13)
}
  0x7e   : > { %s765_s17 = smov 128   ;;  %s766_s4 = smov 8  }
  0x7f   : > { %484 = dma.vmem_to_hbm [thread:$0]  (%p904_p0), %s305_s19, 256, %s307_s27, %s292_s24, %s765_s17, %s765_s17, %s766_s4  }
  0x80 PF: > { %s1065_s26 = sld [smem:[#allocation11_spill]]  ;;  %p490_p8 = scmp.ge.s32.totalorder %s760_s18, 2 }
  0x81   : > { %s1066_s6 = sld [smem:[#allocation18_spill]] }
  0x86   : > { %s321_s20 = sand.u32 1, %s1065_s26  }
  0x87   : > { %p1067_p2 = scmp.ne.s32.totalorder %s1066_s6, 0  ;;  %s322_s22 = scalar_lea.sflag [#allocation4], %s321_s20 }
  0x89   : > { %p487_p3 = pnand %p490_p8, %p1067_p2 }
  0x8b   : > { %p488_p4 = pneg %p487_p3 }
  0x8d   : > { %719 = dma.done.wait (%p488_p4), %s322_s22, 256  }
  0x8e   : > { %721 = vsyncadd (%p488_p4), %s322_s22, 4294967040  ;;  %s1068_s18 = sld [smem:[#allocation14_spill]]  ;;  %s1074_s9 = smov %s728_s10 }
  0x8f   : > { %s1069_s23 = sld [smem:[#allocation12_spill]]  ;;  %s1076_s12 = smov %s740_s13 }
  0x90   : > { %s1070_s11 = sld [smem:[#allocation17_spill]]  ;;  %s1077_s13 = smov %s744_s14 }
  0x91   : > { %s1071_s29 = sld [smem:[#allocation16_spill]]  ;;  %s1079_s15 = smov %s752_s16 }
  0x92   : > { %s1072_s21 = sld [smem:[#allocation13_spill]] }
  0x93   : > { %s1073_s17 = sld [smem:[#allocation15_spill]] }
  0x94   : > { %p18_p0 = scmp.ge.s32.totalorder %s1068_s18, 6  }
  0x95   : > { %s1075_s10 = smov %s1069_s23 }
  0x96   :  { %20 = sbr.rel (!%p18_p0) target bundleno = 10 (0xa), region = 86 }
  0x97   : > { %s1078_s14 = smov %s1071_s29 }
  0x98   : > { %s1080_s16 = smov %s1072_s21 }
  0x9b   :  { %328 = vsyncpa [#allocation3], 1 }
  0x9c   :  { %330 = vsyncpa [#allocation3 + $0x1], 1 }
  0x9d   :  { %331 = vsyncpa [#allocation6], 1 }
  0x9e   :  { %333 = vsyncpa [#allocation6 + $0x1], 1 }
  0x9f   :  { %334 = vsyncpa [#allocation4], 1 }
  0xa0   :  { %336 = vsyncpa [#allocation4 + $0x1], 1 }

</bundles_post_ra>
